<compile_context>
chip_gen: v6e
topology: v6e:2x2x1
jax: 0.10.0
libtpu: 0.0.40
codegen_flags: <defaults>
</compile_context>

<pallas_src>
import functools

import jax
import jax.numpy as jnp
from jax.experimental import pallas as pl
from jax.experimental.pallas import tpu as pltpu

_EPS = 1e-6  # matches torch.nn.functional.pairwise_distance default eps


def _round_up(x, m):
    return (x + m - 1) // m * m


def _cdiv(a, b):
    return -(-a // b)


def _vmem_capacity_bytes():
    """Physical VMEM per TensorCore; conservative fallback if the query fails."""
    try:
        info = pltpu.get_tpu_info()
        for name in ("vmem_capacity_bytes", "vmem_bytes", "vmem_size_bytes"):
            v = getattr(info, name, None)
            if v:
                return int(v)
    except Exception:
        pass
    return 64 * 1024 * 1024  # v7x per-TensorCore VMEM (smallest of v5e/v6e/v7x)


def _tensorcores_per_device():
    """2 on v7x (two TensorCores per chip), else 1 (v5e/v6e)."""
    try:
        dev = jax.devices()[0]
        if (getattr(dev, "platform", "") == "tpu"
                and "v7" in str(getattr(dev, "device_kind", "")).lower()):
            return 2
    except Exception:
        pass
    return 1


def _contrastive_loss_kernel(o1_ref, o2_ref, lbl_ref, out_ref, acc_ref, *,
                             margin, feat, pack):
    i = pl.program_id(1)  # sequential reduction over batch tiles

    @pl.when(i == 0)
    def _init():
        acc_ref[...] = jnp.zeros_like(acc_ref)

    # Subtract in the native dtype (bf16 VALU on v6e/v7x); single upcast to f32.
    diff = (o1_ref[...] - o2_ref[...]).astype(jnp.float32) + _EPS
    diff2 = diff * diff                                    # (tbp, pack*feat), lane-dense

    if pack == 1:
        sq = jnp.sum(diff2, axis=-1, keepdims=True)        # (tbp, 1)
    else:
        # Per-original-row sums via a tiny block-diagonal selector matmul: keeps the
        # packed feature axis lane-dense and uses the otherwise-idle MXU slot.
        dp = pack * feat
        j = jax.lax.broadcasted_iota(jnp.int32, (dp, pack), 0)
        k = jax.lax.broadcasted_iota(jnp.int32, (dp, pack), 1)
        sel = ((j >= k * feat) & (j < (k + 1) * feat)).astype(jnp.float32)
        sq = jnp.dot(diff2, sel, preferred_element_type=jnp.float32)  # (tbp, pack)

    dist = jnp.sqrt(sq)                                    # EUP
    hinge = jnp.maximum(margin - dist, 0.0)
    lbl = lbl_ref[...]                                     # (tbp, pack) f32
    # Fused combine: (1-l)*sq + l*hinge^2 == sq + l*(hinge^2 - sq)
    per_sample = sq + lbl * (hinge * hinge - sq)

    row_sum = jnp.sum(per_sample, axis=-1, keepdims=True)          # (tbp, 1)
    acc_ref[...] += jnp.sum(row_sum, axis=0, keepdims=True)        # (1, 1)

    @pl.when(i == pl.num_programs(1) - 1)
    def _finalize():
        out_ref[...] = acc_ref[...].reshape(1, 1, 1)               # partial sum of split p


def contrastive_loss(output1, output2, label, margin=0.5, *,
                     num_splits=None, max_tile_rows=None):
    """Pallas TPU implementation of ContrastiveLoss.forward. Returns a scalar."""
    B, D = output1.shape
    if output2.dtype != output1.dtype:
        output2 = output2.astype(output1.dtype)
    itemsize = jnp.dtype(output1.dtype).itemsize

    # ---- lane-dense packing of the feature axis (D < 128): view (B, D) as (B/r, r*D).
    r = max(1, 128 // D) if D < 128 else 1
    dp = r * D
    align = 8 * r

    # ---- generation-aware tile sizing
    multi_core = _tensorcores_per_device() > 1
    if num_splits is None:
        num_splits = 2 if multi_core else 1
    num_splits = max(1, int(num_splits))

    phys_vmem = _vmem_capacity_bytes()
    vmem_limit = int(min(phys_vmem * 3 // 4, 96 * 1024 * 1024))     # 48 MiB on v7x, 96 MiB on v5e/v6e
    footprint_budget = int(min(phys_vmem // 2, 48 * 1024 * 1024))
    max_stream_bytes = 8 * 1024 * 1024   # ~8 MiB of input per step: 85-90% of HBM roofline

    # VMEM per packed tile row: 2 double-buffered native-dtype inputs, lane-padded
    # (tbp,128) f32 label buffers, and ~3 f32 temporaries on the main path.
    dp_pad = _round_up(dp, 128)
    per_packed_row = 4 * dp * itemsize + 2 * 128 * 4 + 3 * dp_pad * 4
    tbp_cap = min(footprint_budget // per_packed_row,
                  max_stream_bytes // max(1, 2 * dp * itemsize))
    tbp_cap = max(8, (tbp_cap // 8) * 8)
    tb_cap = tbp_cap * r
    if max_tile_rows is not None:
        tb_cap = max(align, min(tb_cap, (max_tile_rows // align) * align))

    B_aligned = _round_up(B, align)
    if B_aligned <= tb_cap:                 # whole batch fits a single tile
        num_splits, tiles_per_split, tb = 1, 1, B_aligned
    else:                                   # even out tiles -> minimal padded rows
        total_tiles = _round_up(_cdiv(B_aligned, tb_cap), num_splits)
        tiles_per_split = total_tiles // num_splits
        tb = _round_up(_cdiv(B_aligned, total_tiles), align)
    B_pad = num_splits * tiles_per_split * tb
    tbp = tb // r

    # ---- padding chosen so padded rows contribute exactly zero (no in-kernel mask):
    #      o1_pad=0, o2_pad=eps  ->  diff = 0 - eps + eps = 0 ; label_pad = 0.
    lbl = jnp.asarray(label).reshape(B).astype(jnp.float32)
    if B_pad != B:
        pad = B_pad - B
        output1 = jnp.pad(output1, ((0, pad), (0, 0)))
        output2 = jnp.pad(output2, ((0, pad), (0, 0)), constant_values=_EPS)
        lbl = jnp.pad(lbl, (0, pad))
    o1p = output1.reshape(B_pad // r, dp)
    o2p = output2.reshape(B_pad // r, dp)
    lblp = lbl.reshape(B_pad // r, r)

    kernel = functools.partial(_contrastive_loss_kernel,
                               margin=float(margin), feat=D, pack=r)

    cost = pl.CostEstimate(
        flops=4 * B_pad * D + 10 * B_pad,
        transcendentals=B_pad,
        bytes_accessed=2 * B_pad * D * itemsize + B_pad * 4 + num_splits * 4,
    )

    if num_splits > 1 and multi_core and hasattr(pltpu, "CORE_PARALLEL"):
        dims = (pltpu.CORE_PARALLEL, pltpu.ARBITRARY)   # shard the split axis across v7x's 2 TCs
    else:
        dims = ("arbitrary", "arbitrary")

    tps = tiles_per_split
    partials = pl.pallas_call(
        kernel,
        out_shape=jax.ShapeDtypeStruct((num_splits, 1, 1), jnp.float32),
        grid_spec=pltpu.PrefetchScalarGridSpec(
            num_scalar_prefetch=0,
            grid=(num_splits, tiles_per_split),
            in_specs=[
                pl.BlockSpec((tbp, dp), lambda p, i: (p * tps + i, 0)),
                pl.BlockSpec((tbp, dp), lambda p, i: (p * tps + i, 0)),
                pl.BlockSpec((tbp, r), lambda p, i: (p * tps + i, 0)),
            ],
            out_specs=pl.BlockSpec((1, 1, 1), lambda p, i: (p, 0, 0)),
            scratch_shapes=[pltpu.VMEM((1, 1), jnp.float32)],
        ),
        compiler_params=pltpu.CompilerParams(
            dimension_semantics=dims,
            vmem_limit_bytes=vmem_limit),
        cost_estimate=cost,
    )(o1p, o2p, lblp)

    return jnp.sum(partials) / B


def _reference(output1, output2, label, margin=0.5):
    # Pure-JAX reference mirroring the PyTorch module exactly (compute in f32).
    o1 = output1.astype(jnp.float32)
    o2 = output2.astype(jnp.float32)
    d = jnp.sqrt(jnp.sum((o1 - o2 + _EPS) ** 2, axis=-1))
    lbl = label.astype(jnp.float32)
    return jnp.mean((1.0 - lbl) * d**2 + lbl * jnp.maximum(margin - d, 0.0) ** 2)


if __name__ == "__main__":
    key = jax.random.PRNGKey(0)
    k1, k2, k3 = jax.random.split(key, 3)

    # 1) Small shapes consistent with the module (a batch of embedding pairs).
    #    D=32 exercises the lane-dense packing path (r=4) + selector-matmul reduce.
    B, D = 8, 32
    o1 = jax.random.normal(k1, (B, D), dtype=jnp.float32)
    o2 = jax.random.normal(k2, (B, D), dtype=jnp.float32)
    lbl = jax.random.bernoulli(k3, p=0.5, shape=(B,)).astype(jnp.float32)
    loss = jax.block_until_ready(contrastive_loss(o1, o2, lbl, margin=0.5))
    ref = _reference(o1, o2, lbl, margin=0.5)
    assert jnp.allclose(loss, ref, rtol=1e-3, atol=1e-3), (loss, ref)

    # 2) Non-divisible batch with a forced small tile + 2-way split: exercises the
    #    tiled reduction grid, the zero-contribution padding and the r=1 path.
    B2, D2 = 300, 128
    o1b = jax.random.normal(k1, (B2, D2), dtype=jnp.float32)
    o2b = jax.random.normal(k2, (B2, D2), dtype=jnp.float32)
    lblb = jax.random.bernoulli(k3, p=0.5, shape=(B2,)).astype(jnp.float32)
    loss2 = jax.block_until_ready(
        contrastive_loss(o1b, o2b, lblb, margin=0.5, num_splits=2, max_tile_rows=64))
    ref2 = _reference(o1b, o2b, lblb, margin=0.5)
    assert jnp.allclose(loss2, ref2, rtol=1e-5, atol=1e-5), (loss2, ref2)

    # 3) Native bf16 inputs: no wrapper-side upcast; bf16 subtract, f32 accumulate.
    B3, D3 = 100, 256
    o1h = jax.random.normal(k1, (B3, D3), dtype=jnp.bfloat16)
    o2h = jax.random.normal(k2, (B3, D3), dtype=jnp.bfloat16)
    lblh = jax.random.bernoulli(k3, p=0.5, shape=(B3,)).astype(jnp.float32)
    loss3 = jax.block_until_ready(contrastive_loss(o1h, o2h, lblh, margin=0.5))
    ref3 = _reference(o1h, o2h, lblh, margin=0.5)
    assert jnp.allclose(loss3, ref3, rtol=2e-3, atol=2e-3), (loss3, ref3)

    print("KERNEL_OK")
</pallas_src>

<mosaic_0001>
module attributes {stable_mosaic.version = 11 : i64} {
  func.func @_contrastive_loss_kernel(%arg0: i32, %arg1: i32, %arg2: memref<8x128xf32, #tpu.memory_space<vmem>>, %arg3: memref<8x128xf32, #tpu.memory_space<vmem>>, %arg4: memref<8x4xf32, #tpu.memory_space<vmem>>, %arg5: memref<1x1x1xf32, #tpu.memory_space<vmem>>, %arg6: memref<1x1xf32, #tpu.memory_space<vmem>>) attributes {dimension_semantics = [#tpu.dimension_semantics<arbitrary>, #tpu.dimension_semantics<arbitrary>], iteration_bounds = array<i64: 1, 1>, scalar_prefetch = 0 : i64, scratch_operands = 1 : i64, tpu.core_type = #tpu.core_type<tc>, window_params = [{transform_indices = @transform_0, window_bounds = array<i64: 8, 128>}, {transform_indices = @transform_1, window_bounds = array<i64: 8, 128>}, {transform_indices = @transform_2, window_bounds = array<i64: 8, 4>}, {transform_indices = @transform_3, window_bounds = array<i64: 1, 1, 1>}]} {
    %c0_i32 = arith.constant 0 : i32
    %0 = arith.cmpi eq, %arg1, %c0_i32 : i32
    %1 = arith.extui %0 : i1 to i32
    %c0_i32_0 = arith.constant 0 : i32
    %2 = arith.cmpi ne, %1, %c0_i32_0 : i32
    scf.if %2 {
      %cst_18 = arith.constant 0.000000e+00 : f32
      %43 = vector.broadcast %cst_18 : f32 to vector<1x1xf32>
      %c0_19 = arith.constant 0 : index
      %c0_20 = arith.constant 0 : index
      %44 = vector.load %arg6[%c0_19, %c0_20] : memref<1x1xf32, #tpu.memory_space<vmem>>, vector<1x1xf32>
      tpu.vector_store %arg6[%c0_19, %c0_20], %43 {strides = array<i32>} : memref<1x1xf32, #tpu.memory_space<vmem>>, vector<1x1xf32>,
    } else {
    }
    %c0 = arith.constant 0 : index
    %c0_1 = arith.constant 0 : index
    %3 = vector.load %arg2[%c0, %c0_1] : memref<8x128xf32, #tpu.memory_space<vmem>>, vector<8x128xf32>
    %c0_2 = arith.constant 0 : index
    %c0_3 = arith.constant 0 : index
    %4 = vector.load %arg3[%c0_2, %c0_3] : memref<8x128xf32, #tpu.memory_space<vmem>>, vector<8x128xf32>
    %5 = arith.subf %3, %4 : vector<8x128xf32>
    %cst = arith.constant 9.99999997E-7 : f32
    %6 = vector.broadcast %cst : f32 to vector<8x128xf32>
    %7 = arith.addf %5, %6 : vector<8x128xf32>
    %8 = arith.mulf %7, %7 : vector<8x128xf32>
    %9 = tpu.iota {dimensions = array<i32: 0>} : vector<128x4xi32>
    %10 = tpu.iota {dimensions = array<i32: 1>} : vector<128x4xi32>
    %c32_i32 = arith.constant 32 : i32
    %11 = vector.broadcast %c32_i32 : i32 to vector<128x4xi32>
    %12 = arith.muli %10, %11 : vector<128x4xi32>
    %13 = arith.cmpi sge, %9, %12 : vector<128x4xi32>
    %c1_i32 = arith.constant 1 : i32
    %14 = vector.broadcast %c1_i32 : i32 to vector<128x4xi32>
    %15 = arith.addi %10, %14 : vector<128x4xi32>
    %c32_i32_4 = arith.constant 32 : i32
    %16 = vector.broadcast %c32_i32_4 : i32 to vector<128x4xi32>
    %17 = arith.muli %15, %16 : vector<128x4xi32>
    %18 = arith.cmpi slt, %9, %17 : vector<128x4xi32>
    %19 = arith.andi %13, %18 : vector<128x4xi1>
    %20 = arith.extui %19 : vector<128x4xi1> to vector<128x4xi32>
    %21 = arith.sitofp %20 : vector<128x4xi32> to vector<128x4xf32>
    %cst_5 = arith.constant dense<0.000000e+00> : vector<8x4xf32>
    %22 = tpu.matmul %8, %21, %cst_5 {dimension_numbers = #tpu.dot_dimension_numbers<[1], [0], [0], [1], [0, 0, 1, 1], [], []>} : vector<8x128xf32>, vector<128x4xf32>, vector<8x4xf32> -> vector<8x4xf32>
    %23 = math.sqrt %22 : vector<8x4xf32>
    %cst_6 = arith.constant 5.000000e-01 : f32
    %24 = vector.broadcast %cst_6 : f32 to vector<8x4xf32>
    %25 = arith.subf %24, %23 : vector<8x4xf32>
    %cst_7 = arith.constant 0.000000e+00 : f32
    %26 = vector.broadcast %cst_7 : f32 to vector<8x4xf32>
    %27 = arith.maximumf %25, %26 : vector<8x4xf32>
    %c0_8 = arith.constant 0 : index
    %c0_9 = arith.constant 0 : index
    %28 = vector.load %arg4[%c0_8, %c0_9] : memref<8x4xf32, #tpu.memory_space<vmem>>, vector<8x4xf32>
    %29 = arith.mulf %27, %27 : vector<8x4xf32>
    %30 = arith.subf %29, %22 : vector<8x4xf32>
    %31 = arith.mulf %28, %30 : vector<8x4xf32>
    %32 = arith.addf %22, %31 : vector<8x4xf32>
    %cst_10 = arith.constant dense<0.000000e+00> : vector<8xf32>
    %33 = vector.multi_reduction <add>, %32, %cst_10 [1] : vector<8x4xf32> to vector<8xf32>
    %34 = vector.shape_cast %33 : vector<8xf32> to vector<8x1xf32>
    %c0_11 = arith.constant 0 : index
    %c0_12 = arith.constant 0 : index
    %35 = vector.load %arg6[%c0_11, %c0_12] : memref<1x1xf32, #tpu.memory_space<vmem>>, vector<1x1xf32>
    %cst_13 = arith.constant dense<0.000000e+00> : vector<1xf32>
    %36 = vector.multi_reduction <add>, %34, %cst_13 [0] : vector<8x1xf32> to vector<1xf32>
    %37 = vector.shape_cast %36 : vector<1xf32> to vector<1x1xf32>
    %38 = arith.addf %35, %37 : vector<1x1xf32>
    %c0_14 = arith.constant 0 : index
    %c0_15 = arith.constant 0 : index
    %39 = vector.load %arg6[%c0_14, %c0_15] : memref<1x1xf32, #tpu.memory_space<vmem>>, vector<1x1xf32>
    tpu.vector_store %arg6[%c0_14, %c0_15], %38 {strides = array<i32>} : memref<1x1xf32, #tpu.memory_space<vmem>>, vector<1x1xf32>,
    %c0_i32_16 = arith.constant 0 : i32
    %40 = arith.cmpi eq, %arg1, %c0_i32_16 : i32
    %41 = arith.extui %40 : i1 to i32
    %c0_i32_17 = arith.constant 0 : i32
    %42 = arith.cmpi ne, %41, %c0_i32_17 : i32
    scf.if %42 {
      %c0_18 = arith.constant 0 : index
      %c0_19 = arith.constant 0 : index
      %43 = vector.load %arg6[%c0_18, %c0_19] : memref<1x1xf32, #tpu.memory_space<vmem>>, vector<1x1xf32>
      %44 = vector.shape_cast %43 : vector<1x1xf32> to vector<1x1x1xf32>
      %c0_20 = arith.constant 0 : index
      %c0_21 = arith.constant 0 : index
      %c0_22 = arith.constant 0 : index
      %45 = vector.load %arg5[%c0_20, %c0_21, %c0_22] : memref<1x1x1xf32, #tpu.memory_space<vmem>>, vector<1x1x1xf32>
      tpu.vector_store %arg5[%c0_20, %c0_21, %c0_22], %44 {strides = array<i32>} : memref<1x1x1xf32, #tpu.memory_space<vmem>>, vector<1x1x1xf32>,
    } else {
    }
    return
  }
  func.func @transform_0(%arg0: i32, %arg1: i32) -> (i32, i32) {
    %c1_i32 = arith.constant 1 : i32
    %0 = arith.muli %arg0, %c1_i32 : i32
    %1 = arith.addi %0, %arg1 : i32
    %c0_i32 = arith.constant 0 : i32
    %c0_i32_0 = arith.constant 0 : i32
    return %1, %c0_i32 : i32, i32
  }
  func.func @transform_1(%arg0: i32, %arg1: i32) -> (i32, i32) {
    %c1_i32 = arith.constant 1 : i32
    %0 = arith.muli %arg0, %c1_i32 : i32
    %1 = arith.addi %0, %arg1 : i32
    %c0_i32 = arith.constant 0 : i32
    %c0_i32_0 = arith.constant 0 : i32
    return %1, %c0_i32 : i32, i32
  }
  func.func @transform_2(%arg0: i32, %arg1: i32) -> (i32, i32) {
    %c1_i32 = arith.constant 1 : i32
    %0 = arith.muli %arg0, %c1_i32 : i32
    %1 = arith.addi %0, %arg1 : i32
    %c0_i32 = arith.constant 0 : i32
    %c0_i32_0 = arith.constant 0 : i32
    return %1, %c0_i32 : i32, i32
  }
  func.func @transform_3(%arg0: i32, %arg1: i32) -> (i32, i32, i32) {
    %c0_i32 = arith.constant 0 : i32
    %c0_i32_0 = arith.constant 0 : i32
    %c0_i32_1 = arith.constant 0 : i32
    return %arg0, %c0_i32, %c0_i32_0 : i32, i32, i32
  }
}

</mosaic_0001>

<bundles_post_ra>
// kernel: tpu_custom_call.1
= control target key start
LH: loop header
LB: loop body
LE: loop exit
PB: predicated region body
PF: predicated region fallthrough
CT: control target
= control target key end

     0   :  { %8 = vsyncpa [#allocation4], 0  ;;  %s572_s0 = inlined_call_operand.vmem [shape: f32[8,128], index: 0, kind: input, shape index: {}]   ;;  %s573_s1 = inlined_call_operand.hbm [shape: f32[8,128], index: 1, kind: input, shape index: {}]   ;;  %s574_s2 = inlined_call_operand.vmem [shape: f32[8,4], index: 2, kind: input, shape index: {}]   ;;  %s575_s3 = inlined_call_operand.hbm [shape: f32[1,1,1], index: 3, kind: output, shape index: {}]  }
   0x1   :  { %9 = vsyncpa [#allocation5], 0  ;;  %s443_s12 = smov [#allocation3]  }
   0x2   :  { %s27_s13 = sshll.u32 %s443_s12, 4  ;;  %s28_s13 = int_to_ptr.vmem [resolvable:$true] %s27_s13 }
   0x3   :  { %s407_s14 = scalar_lea.vmem %s28_s13, 128  ;;  %p412_p1 = scmp.lt.s32.totalorder %s28_s13, %s28_s13 }
   0x4   :  { %p408_p0 = scmp.ne.s32.totalorder %s28_s13, %s407_s14  ;;  %p413_p2 = scmp.lt.s32.totalorder %s407_s14, %s407_s14 }
   0x6   :  { %p414_p3 = por %p413_p2, %p412_p1 }
   0x8   :  { %p415_p4 = pnand %p414_p3, %p408_p0 }
   0xa   :  { %418 = shalt.err (!%p415_p4)
}
   0xb   :  { %30 = dma.hbm_to_vmem [thread:$0]  %s573_s1, 128, %s28_s13, [#allocation4]   ;;  %v76_v0 = vlaneseq }
   0xc   :  { %439 = dma.done.wait [#allocation4], 128  }
   0xd   :  { %440 = vsyncadd [#allocation4], 4294967168  ;;  %v444_v1 = vmov 0.0   ;;  %vm445_vm0 = vmmov 0   ;;  %v473_v2 = vshrl.u32 %v76_v0, 7  ;;  %v94_v3 = vand.u32 127, %v76_v0 }
   0xe   :  { %357 = vmatprep.subr.mxu0 %v444_v1  ;;  %389 = vmatprep.mubr.msk.f32.mxu0 %vm445_vm0, %v444_v1  ;;  %v446_v12 = vmov 1.0   ;;  %v71_v22 = vld [vmem:[%s572_s0] sm:$0xff] }
   0xf   :  { %v92_v4 = vadd.s32 120, %v473_v2  ;;  %v476_v5 = vmul.u32 32, %v94_v3  ;;  %v112_v6 = vadd.s32 1, %v94_v3  ;;  %v91_v7 = vadd.s32 112, %v473_v2  ;;  %v72_v23 = vld [vmem:[#allocation3] sm:$0xff] }
  0x10   :  { %v90_v8 = vadd.s32 104, %v473_v2  ;;  %v89_v10 = vadd.s32 96, %v473_v2  ;;  %v88_v11 = vadd.s32 88, %v473_v2  ;;  %v87_v13 = vadd.s32 80, %v473_v2  ;;  %v257_v38 = vld [vmem:[%s574_s2] sm:$0xff]  ;;  %s447_s2 = smov [#allocation6]  }
  0x11   :  { %vm111_vm1 = vcmp.ge.s32.totalorder %v92_v4, %v476_v5  ;;  %v481_v9 = vmul.u32 32, %v112_v6  ;;  %vm110_vm2 = vcmp.ge.s32.totalorder %v91_v7, %v476_v5  ;;  %v86_v14 = vadd.s32 72, %v473_v2  ;;  %s287_s19 = sshll.u32 %s447_s2, 4  ;;  %s288_s19 = int_to_ptr.vmem [resolvable:$true] %s287_s19 }
  0x12   :  { %vm109_vm5 = vcmp.ge.s32.totalorder %v90_v8, %v476_v5  ;;  %vm108_vm9 = vcmp.ge.s32.totalorder %v89_v10, %v476_v5  ;;  %vm107_vm12 = vcmp.ge.s32.totalorder %v88_v11, %v476_v5  ;;  %vm106_vm15 = vcmp.ge.s32.totalorder %v87_v13, %v476_v5  ;;  %s419_s20 = scalar_lea.vmem %s288_s19, 16  ;;  %s423_s21 = scalar_lea.vmem %s288_s19, 32 }
  0x13   :  { %vm129_vm3 = vcmp.lt.s32.totalorder %v92_v4, %v481_v9  ;;  %vm128_vm4 = vcmp.lt.s32.totalorder %v91_v7, %v481_v9  ;;  %vm127_vm6 = vcmp.lt.s32.totalorder %v90_v8, %v481_v9  ;;  %vm126_vm10 = vcmp.lt.s32.totalorder %v89_v10, %v481_v9  ;;  %p420_p5 = scmp.ne.s32.totalorder %s288_s19, %s419_s20  ;;  %p424_p6 = scmp.lt.s32.totalorder %s288_s19, %s288_s19 }
  0x14   :  { %vm145_vm7 = vmand %vm111_vm1, %vm129_vm3  ;;  %vm125_vm13 = vcmp.lt.s32.totalorder %v88_v11, %v481_v9  ;;  %vm124_vm0 = vcmp.lt.s32.totalorder %v87_v13, %v481_v9  ;;  %v85_v15 = vadd.s32 64, %v473_v2  ;;  %vm123_vm3 = vcmp.lt.s32.totalorder %v86_v14, %v481_v9  ;;  %p425_p7 = scmp.lt.s32.totalorder %s423_s21, %s419_s20 }
  0x15   :  { %358 = vmatpush3.msk.msra.mxu0 %vm145_vm7, %v446_v12  ;;  %vm144_vm8 = vmand %vm110_vm2, %vm128_vm4  ;;  %vm105_vm2 = vcmp.ge.s32.totalorder %v86_v14, %v476_v5  ;;  %v84_v16 = vadd.s32 56, %v473_v2  ;;  %v83_v17 = vadd.s32 48, %v473_v2  ;;  %v82_v18 = vadd.s32 40, %v473_v2 }
  0x16   :  { %359 = vmatprep.subr.mxu0 %v444_v1  ;;  %vm143_vm11 = vmand %vm109_vm5, %vm127_vm6  ;;  %vm104_vm5 = vcmp.ge.s32.totalorder %v85_v15, %v476_v5  ;;  %vm122_vm6 = vcmp.lt.s32.totalorder %v85_v15, %v481_v9  ;;  %v81_v19 = vadd.s32 32, %v473_v2  ;;  %v80_v20 = vadd.s32 24, %v473_v2  ;;  %p426_p8 = por %p425_p7, %p424_p6 }
  0x17   :  { %360 = vmatpush3.msk.msra.mxu0 %vm144_vm8, %v446_v12  ;;  %vm142_vm14 = vmand %vm108_vm9, %vm126_vm10  ;;  %vm103_vm8 = vcmp.ge.s32.totalorder %v84_v16, %v476_v5  ;;  %vm121_vm9 = vcmp.lt.s32.totalorder %v84_v16, %v481_v9  ;;  %v79_v21 = vadd.s32 16, %v473_v2  ;;  %v78_v24 = vadd.s32 8, %v473_v2 }
  0x18   :  { %361 = vmatprep.subr.mxu0 %v444_v1  ;;  %vm141_vm1 = vmand %vm107_vm12, %vm125_vm13  ;;  %vm120_vm12 = vcmp.lt.s32.totalorder %v83_v17, %v481_v9  ;;  %v73_v25 = vsub.f32 %v71_v22, %v72_v23  ;;  %p427_p9 = pnand %p426_p8, %p420_p5 }
  0x19   :  { %362 = vmatpush3.msk.msra.mxu0 %vm143_vm11, %v446_v12  ;;  %vm140_vm4 = vmand %vm106_vm15, %vm124_vm0  ;;  %vm102_vm11 = vcmp.ge.s32.totalorder %v83_v17, %v476_v5  ;;  %vm119_vm15 = vcmp.lt.s32.totalorder %v82_v18, %v481_v9 }
  0x1a   :  { %363 = vmatprep.subr.mxu0 %v444_v1  ;;  %vm139_vm7 = vmand %vm105_vm2, %vm123_vm3  ;;  %vm118_vm2 = vcmp.lt.s32.totalorder %v81_v19, %v481_v9  ;;  %v74_v26 = vadd.f32 1e-06, %v73_v25 }
  0x1b   :  { %364 = vmatpush3.msk.msra.mxu0 %vm142_vm14, %v446_v12  ;;  %vm138_vm10 = vmand %vm104_vm5, %vm122_vm6  ;;  %vm101_vm14 = vcmp.ge.s32.totalorder %v82_v18, %v476_v5  ;;  %vm117_vm5 = vcmp.lt.s32.totalorder %v80_v20, %v481_v9 }
  0x1c   :  { %365 = vmatprep.subr.mxu0 %v444_v1  ;;  %vm137_vm13 = vmand %vm103_vm8, %vm121_vm9  ;;  %vm116_vm8 = vcmp.lt.s32.totalorder %v79_v21, %v481_v9  ;;  %v75_v27 = vmul.f32 %v74_v26, %v74_v26 }
  0x1d   :  { %366 = vmatpush3.msk.msra.mxu0 %vm141_vm1, %v446_v12  ;;  %vm136_vm0 = vmand %vm102_vm11, %vm120_vm12  ;;  %vm100_vm1 = vcmp.ge.s32.totalorder %v81_v19, %v476_v5  ;;  %vm115_vm11 = vcmp.lt.s32.totalorder %v78_v24, %v481_v9 }
  0x1e   :  { %367 = vmatprep.subr.mxu0 %v444_v1  ;;  %vm135_vm3 = vmand %vm101_vm14, %vm119_vm15  ;;  %vm114_vm14 = vcmp.lt.s32.totalorder %v473_v2, %v481_v9 }
  0x1f   :  { %368 = vmatpush3.msk.msra.mxu0 %vm140_vm4, %v446_v12  ;;  %vm99_vm4 = vcmp.ge.s32.totalorder %v80_v20, %v476_v5  ;;  %vm134_vm6 = vmand %vm100_vm1, %vm118_vm2 }
  0x20   :  { %369 = vmatprep.subr.mxu0 %v444_v1  ;;  %vm133_vm9 = vmand %vm99_vm4, %vm117_vm5  ;;  %vm69_vm4 = vcmask 0  }
  0x21   :  { %370 = vmatpush3.msk.msra.mxu0 %vm139_vm7, %v446_v12  ;;  %vm98_vm7 = vcmp.ge.s32.totalorder %v79_v21, %v476_v5  ;;  %70 = vst.msk [vmem:[#allocation2] sm:$0x1] %vm69_vm4, %v444_v1 }
  0x22   :  { %371 = vmatprep.subr.mxu0 %v444_v1  ;;  %vm132_vm12 = vmand %vm98_vm7, %vm116_vm8 }
  0x23   :  { %372 = vmatpush3.msk.msra.mxu0 %vm138_vm10, %v446_v12  ;;  %vm97_vm10 = vcmp.ge.s32.totalorder %v78_v24, %v476_v5 }
  0x24   :  { %373 = vmatprep.subr.mxu0 %v444_v1  ;;  %vm131_vm15 = vmand %vm97_vm10, %vm115_vm11 }
  0x25   :  { %374 = vmatpush3.msk.msra.mxu0 %vm137_vm13, %v446_v12  ;;  %vm96_vm13 = vcmp.ge.s32.totalorder %v473_v2, %v476_v5 }
  0x26   :  { %375 = vmatprep.subr.mxu0 %v444_v1 }
  0x27   :  { %376 = vmatpush3.msk.msra.mxu0 %vm136_vm0, %v446_v12  ;;  %vm130_vm0 = vmand %vm96_vm13, %vm114_vm14 }
  0x28   :  { %377 = vmatprep.subr.mxu0 %v444_v1  ;;  %v266_v49 = vld [vmem:[#allocation2] sm:$0x1] }
  0x29   :  { %378 = vmatpush3.msk.msra.mxu0 %vm135_vm3, %v446_v12  ;;  %vm262_vm3 = vcmask 31744  }
  0x2a   :  { %379 = vmatprep.subr.mxu0 %v444_v1 }
  0x2b   :  { %380 = vmatpush3.msk.msra.mxu0 %vm134_vm6, %v446_v12 }
  0x2c   :  { %381 = vmatprep.subr.mxu0 %v444_v1 }
  0x2d   :  { %382 = vmatpush3.msk.msra.mxu0 %vm133_vm9, %v446_v12 }
  0x2e   :  { %383 = vmatprep.subr.mxu0 %v444_v1 }
  0x2f   :  { %384 = vmatpush3.msk.msra.mxu0 %vm132_vm12, %v446_v12 }
  0x30   :  { %385 = vmatprep.subr.mxu0 %v444_v1 }
  0x31   :  { %386 = vmatpush3.msk.msra.mxu0 %vm131_vm15, %v446_v12 }
  0x32   :  { %387 = vmatprep.subr.mxu0 %v444_v1 }
  0x33   :  { %388 = vmatpush3.msk.msra.mxu0 %vm130_vm0, %v446_v12 }
  0x34   :  { %390 = vmatmul.mubr.f32.vlgmr.msra.gmra.mxu0 %v75_v27 }
  0xf4   :  { %v244_v28 = vpop.f32.mrf.mxu0 }
  0xf5   :  { %397 = vrsqrt.f32 %v244_v28  ;;  %vm250_vm1 = vcmp.eq.f32.partialorder %v244_v28, inf  ;;  %v253_v32 = vand.u32 2147483648, %v244_v28  ;;  %vm252_vm2 = vcmp.eq.f32.partialorder %v244_v28, 0.0 }
  0xf6   :  { %v391_v29 = vpop.f32.mrf.mxu0 }
 0x102   :  { %v398_v30 = vpop.eup %397 }
 0x103   :  { %v249_v31 = vmul.f32 %v398_v30, %v244_v28 }
 0x105   :  { %v251_v33 = vsel %vm250_vm1, %v244_v28, %v249_v31 }
 0x106   :  { %v254_v34 = vsel %vm252_vm2, %v253_v32, %v251_v33 }
 0x107   :  { %v255_v35 = vsub.f32 0.5, %v254_v34 }
 0x109   :  { %v256_v36 = vmax.f32 %v255_v35, 0.0 }
 0x10b   :  { %v258_v37 = vmul.f32 %v256_v36, %v256_v36 }
 0x10d   :  { %v259_v39 = vsub.f32 %v258_v37, %v244_v28 }
 0x10f   :  { %v260_v40 = vmul.f32 %v259_v39, %v257_v38 }
 0x111   :  { %v261_v41 = vadd.f32 %v260_v40, %v244_v28 }
 0x113   :  { %v263_v42 = vsel %vm262_vm3, %v261_v41, 0.0 }
 0x114   :  { %264 = vadd.xlane.f32.xlu0 %v263_v42 }
 0x19d   :  { %v265_v43 = vpop.xlane.xlu0 %264 }
 0x19e   :  { %v267_v44 = vrot.slane %v265_v43, 4 }
 0x1a0   :  { %v268_v45 = vadd.f32 %v267_v44, %v265_v43 }
 0x1a2   :  { %v269_v46 = vrot.slane %v268_v45, 2 }
 0x1a4   :  { %v270_v47 = vadd.f32 %v269_v46, %v268_v45 }
 0x1a6   :  { %v271_v48 = vrot.slane %v270_v47, 1 }
 0x1a8   :  { %v272_v50 = vadd.f32 %v271_v48, %v270_v47 }
 0x1aa   :  { %v273_v51 = vadd.f32 %v272_v50, %v266_v49 }
 0x1ac   :  { %275 = vst.msk [vmem:[#allocation2] sm:$0x1] %vm69_vm4, %v273_v51 }
 0x1b3   :  { %v279_v52 = vld [vmem:[#allocation2] sm:$0x1] }
 0x1b4   :  { %280 = vst.msk [vmem:[#allocation6] sm:$0x1] %vm69_vm4, %v279_v52 }
 0x1b5   :  { %430 = shalt.err (!%p427_p9)
}
 0x1b6   :  { %290 = dma.vmem_to_hbm [thread:$0]  %s288_s19, 16, %s575_s3, [#allocation5]  }
 0x1b7   :  { %441 = dma.done.wait [#allocation5], 16  }
 0x1b8   :  { %442 = vsyncadd [#allocation5], 4294967280 }
 0x1b9   :  { %294 = vsyncpa [#allocation4], 1 }
 0x1ba   :  { %295 = vsyncpa [#allocation5], 1 }

</bundles_post_ra>
